<compile_context>
chip_gen: v6e
topology: v6e:2x2x1
jax: 0.10.0
libtpu: 0.0.40
codegen_flags: <defaults>
</compile_context>

<pallas_src>
import functools

import jax
import jax.numpy as jnp
from jax.experimental import pallas as pl
from jax.experimental.pallas import tpu as pltpu

HOLE = 8                                 # erase side (reference hardcodes 28 for 224x224)
_BAND_BUDGET_BYTES = 8 * 1024 * 1024     # single band buffer per grid step (v7x-safe)
_VMEM_LIMIT_BYTES = 48 * 1024 * 1024     # < v7x's 64 MiB physical VMEM


def _round_up(x, m):
    return ((x + m - 1) // m) * m


def _band_rows_for(hole, h):
    """Static, sublane-aligned band height covering the hole for any start row.

    Needs (i % 8) + hole <= band_rows so an 8-aligned band start still covers
    rows [i, i+hole).  Falls back to full H when the band would not be smaller
    (or H itself is not sublane-aligned), keeping every DMA tile-aligned.
    """
    band = _round_up(hole + 7, 8)
    if band >= h or h % 8 != 0:
        return h
    return band


def _pick_tile_nc(nc, band_rows, w, itemsize, budget=_BAND_BUDGET_BYTES):
    """Largest channel tile whose (tile, band_rows, W) VMEM band fits `budget`.

    Accounts for lane padding (W rounded up to 128 in VMEM).  Clamped so that
    NC >= 16 yields at least two parallel grid steps (v7x megacore).
    """
    w_pad = _round_up(w, 128)
    bytes_per_nc = band_rows * w_pad * itemsize
    max_tile = max(1, budget // bytes_per_nc)
    if nc <= max_tile:
        tile = nc
    else:
        tile = max(8, (max_tile // 8) * 8)
    if tile >= nc and nc >= 16:          # ensure >=2 steps for the two TCs on v7x
        tile = max(8, ((nc // 2) // 8) * 8)
    return min(tile, nc)


def _cutout_band_kernel(ij_ref, x_hbm, o_hbm, band, sem, *,
                        hole, height, width, band_rows, tile_nc, nc_total):
    """Rewrite only the hole's row band of the aliased (NC, H, W) tensor.

    ij_ref: SMEM int32[2]              -- scalar-prefetched (i, j)
    x_hbm : ANY/HBM (NC, H, W)         -- input tensor (aliased with o_hbm)
    o_hbm : ANY/HBM (NC, H, W)         -- output tensor (same buffer as x_hbm)
    band  : VMEM (tile_nc, band_rows, W) scratch
    sem   : DMA semaphore
    """
    g = pl.program_id(0)
    # Channel-tile start; clamp the tail tile so the slice stays in bounds.
    # Overlap with the previous tile is benign: the rewritten bytes are
    # bit-identical, so even two cores racing on the overlap write the same data.
    nc0 = jnp.minimum(g * tile_nc, nc_total - tile_nc)

    i = ij_ref[0]
    j = ij_ref[1]

    # Sublane-aligned row band [r0, r0 + band_rows) covering the clipped erase
    # rows [i, min(i + hole, height)).
    if band_rows >= height:
        r0 = 0
    else:
        r0 = jnp.clip((i // 8) * 8, 0, height - band_rows)

    # Read the band; the rest of the aliased output is never touched.
    load = pltpu.make_async_copy(
        x_hbm.at[pl.ds(nc0, tile_nc), pl.ds(r0, band_rows), :], band, sem)
    load.start()
    load.wait()

    x = band[...]                                           # (tile_nc, band_rows, W)
    rows = r0 + jax.lax.broadcasted_iota(jnp.int32, (1, band_rows, 1), 1)
    cols = jax.lax.broadcasted_iota(jnp.int32, (1, 1, width), 2)
    mask = (rows >= i) & (rows < i + hole) & (cols >= j) & (cols < j + hole)
    band[...] = jnp.where(mask, jnp.asarray(1.0, dtype=x.dtype), x)

    # Write the full-width band back in place.
    store = pltpu.make_async_copy(
        band, o_hbm.at[pl.ds(nc0, tile_nc), pl.ds(r0, band_rows), :], sem)
    store.start()
    store.wait()


def cutout(x, ij, *, hole=HOLE):
    """x: (N, C, H, W) float in [0,1]; ij: int32[2] hole top-left corner."""
    N, C, H, W = x.shape
    NC = N * C
    band_rows = _band_rows_for(hole, H)
    tile_nc = _pick_tile_nc(NC, band_rows, W, x.dtype.itemsize)
    grid = (pl.cdiv(NC, tile_nc),)

    xv = x.reshape(NC, H, W)             # row-addressable, lane = W (full rows)

    out = pl.pallas_call(
        functools.partial(
            _cutout_band_kernel,
            hole=hole, height=H, width=W,
            band_rows=band_rows, tile_nc=tile_nc, nc_total=NC),
        out_shape=jax.ShapeDtypeStruct((NC, H, W), x.dtype),
        grid_spec=pltpu.PrefetchScalarGridSpec(
            num_scalar_prefetch=1,
            grid=grid,
            in_specs=[pl.BlockSpec(memory_space=pl.ANY)],
            out_specs=pl.BlockSpec(memory_space=pl.ANY),
            scratch_shapes=[
                pltpu.VMEM((tile_nc, band_rows, W), x.dtype),
                pltpu.SemaphoreType.DMA(()),
            ],
        ),
        # Output aliases the tensor input: call-arg 0 is the scalar-prefetched
        # (i, j), call-arg 1 is the tensor.  Wrap in jax.jit(donate_argnums=...)
        # in real pipelines to make this a true zero-copy in-place update.
        input_output_aliases={1: 0},
        compiler_params=pltpu.CompilerParams(
            dimension_semantics=("parallel",),
            vmem_limit_bytes=_VMEM_LIMIT_BYTES,
        ),
    )(ij, xv)
    return out.reshape(N, C, H, W)


if __name__ == "__main__":
    key = jax.random.PRNGKey(0)
    k_img, k_i, k_j = jax.random.split(key, 3)

    N, C, H, W = 2, 4, 16, 16
    x = jax.random.uniform(k_img, (N, C, H, W), dtype=jnp.float32)

    # random.randint(0, 224) is inclusive on both ends for a 224-sized image;
    # scaled down: i, j ~ U{0, ..., H}.  The erase block is clipped at the
    # border exactly like TF.erase slicing.
    i = jax.random.randint(k_i, (), 0, H + 1, dtype=jnp.int32)
    j = jax.random.randint(k_j, (), 0, W + 1, dtype=jnp.int32)
    ij = jnp.stack([i, j]).astype(jnp.int32)

    out = jax.block_until_ready(cutout(x, ij))

    # Pure-JAX reference check.
    rows = jnp.arange(H)[:, None]
    cols = jnp.arange(W)[None, :]
    mask = (rows >= i) & (rows < i + HOLE) & (cols >= j) & (cols < j + HOLE)
    ref = jnp.where(mask[None, None, :, :], 1.0, x)
    assert jnp.allclose(out, ref), "mismatch vs reference"

    print("KERNEL_OK")
</pallas_src>

<mosaic_0001>
module attributes {stable_mosaic.version = 11 : i64} {
  func.func @_cutout_band_kernel(%arg0: i32, %arg1: memref<2xi32, #tpu.memory_space<smem>>, %arg2: memref<8x16x16xf32, #tpu.memory_space<any>>, %arg3: memref<8x16x16xf32, #tpu.memory_space<any>>, %arg4: memref<8x16x16xf32, #tpu.memory_space<vmem>>, %arg5: memref<!tpu.dma_semaphore, #tpu.memory_space<semaphore_mem>>) attributes {dimension_semantics = [#tpu.dimension_semantics<parallel>], iteration_bounds = array<i64: 1>, scalar_prefetch = 1 : i64, scratch_operands = 2 : i64, tpu.core_type = #tpu.core_type<tc>, window_params = [{}, {}]} {
    %c8_i32 = arith.constant 8 : i32
    %0 = arith.muli %arg0, %c8_i32 : i32
    %c0_i32 = arith.constant 0 : i32
    %1 = arith.minsi %0, %c0_i32 : i32
    %c0 = arith.constant 0 : index
    %2 = memref.load %arg1[%c0] : memref<2xi32, #tpu.memory_space<smem>>
    %c1 = arith.constant 1 : index
    %3 = memref.load %arg1[%c1] : memref<2xi32, #tpu.memory_space<smem>>
    %c0_i32_0 = arith.constant 0 : i32
    %c0_i32_1 = arith.constant 0 : i32
    %4 = tpu.memref_slice %arg2[%1, %c0_i32_0, %c0_i32_1] : memref<8x16x16xf32, #tpu.memory_space<any>> -> memref<8x16x16xf32, #tpu.memory_space<any>>
    tpu.enqueue_dma source(%4 : memref<8x16x16xf32, #tpu.memory_space<any>>) target(%arg4 : memref<8x16x16xf32, #tpu.memory_space<vmem>>) target_semaphore(%arg5 : memref<!tpu.dma_semaphore, #tpu.memory_space<semaphore_mem>>)
    %c0_i32_2 = arith.constant 0 : i32
    %c0_i32_3 = arith.constant 0 : i32
    %5 = tpu.memref_slice %arg2[%1, %c0_i32_2, %c0_i32_3] : memref<8x16x16xf32, #tpu.memory_space<any>> -> memref<8x16x16xf32, #tpu.memory_space<any>>
    tpu.wait_dma2 semaphore(%arg5 : memref<!tpu.dma_semaphore, #tpu.memory_space<semaphore_mem>>) src(%5 : memref<8x16x16xf32, #tpu.memory_space<any>>) dst(%arg4 : memref<8x16x16xf32, #tpu.memory_space<vmem>>)
    %c0_4 = arith.constant 0 : index
    %c0_5 = arith.constant 0 : index
    %c0_6 = arith.constant 0 : index
    %6 = vector.load %arg4[%c0_4, %c0_5, %c0_6] : memref<8x16x16xf32, #tpu.memory_space<vmem>>, vector<8x16x16xf32>
    %7 = tpu.iota {dimensions = array<i32: 1>} : vector<1x16x1xi32>
    %c0_i32_7 = arith.constant 0 : i32
    %8 = vector.broadcast %c0_i32_7 : i32 to vector<1x16x1xi32>
    %9 = arith.addi %8, %7 : vector<1x16x1xi32>
    %10 = tpu.iota {dimensions = array<i32: 2>} : vector<1x1x16xi32>
    %11 = vector.broadcast %2 : i32 to vector<1x16x1xi32>
    %12 = arith.cmpi sge, %9, %11 : vector<1x16x1xi32>
    %c8_i32_8 = arith.constant 8 : i32
    %13 = arith.addi %2, %c8_i32_8 : i32
    %14 = vector.broadcast %13 : i32 to vector<1x16x1xi32>
    %15 = arith.cmpi slt, %9, %14 : vector<1x16x1xi32>
    %16 = arith.andi %12, %15 : vector<1x16x1xi1>
    %17 = vector.broadcast %3 : i32 to vector<1x1x16xi32>
    %18 = arith.cmpi sge, %10, %17 : vector<1x1x16xi32>
    %19 = vector.broadcast %16 : vector<1x16x1xi1> to vector<1x16x16xi1>
    %20 = vector.broadcast %18 : vector<1x1x16xi1> to vector<1x16x16xi1>
    %21 = arith.andi %19, %20 : vector<1x16x16xi1>
    %c8_i32_9 = arith.constant 8 : i32
    %22 = arith.addi %3, %c8_i32_9 : i32
    %23 = vector.broadcast %22 : i32 to vector<1x1x16xi32>
    %24 = arith.cmpi slt, %10, %23 : vector<1x1x16xi32>
    %25 = vector.broadcast %24 : vector<1x1x16xi1> to vector<1x16x16xi1>
    %26 = arith.andi %21, %25 : vector<1x16x16xi1>
    %cst = arith.constant 1.000000e+00 : f32
    %27 = vector.shape_cast %26 : vector<1x16x16xi1> to vector<1x16x16xi1>
    %28 = vector.broadcast %27 : vector<1x16x16xi1> to vector<8x16x16xi1>
    %29 = vector.broadcast %cst : f32 to vector<8x16x16xf32>
    %30 = arith.select %28, %29, %6 : vector<8x16x16xi1>, vector<8x16x16xf32>
    %c0_10 = arith.constant 0 : index
    %c0_11 = arith.constant 0 : index
    %c0_12 = arith.constant 0 : index
    %31 = vector.load %arg4[%c0_10, %c0_11, %c0_12] : memref<8x16x16xf32, #tpu.memory_space<vmem>>, vector<8x16x16xf32>
    tpu.vector_store %arg4[%c0_10, %c0_11, %c0_12], %30 {strides = array<i32>} : memref<8x16x16xf32, #tpu.memory_space<vmem>>, vector<8x16x16xf32>,
    %c0_i32_13 = arith.constant 0 : i32
    %c0_i32_14 = arith.constant 0 : i32
    %32 = tpu.memref_slice %arg3[%1, %c0_i32_13, %c0_i32_14] : memref<8x16x16xf32, #tpu.memory_space<any>> -> memref<8x16x16xf32, #tpu.memory_space<any>>
    tpu.enqueue_dma source(%arg4 : memref<8x16x16xf32, #tpu.memory_space<vmem>>) target(%32 : memref<8x16x16xf32, #tpu.memory_space<any>>) target_semaphore(%arg5 : memref<!tpu.dma_semaphore, #tpu.memory_space<semaphore_mem>>)
    %c0_i32_15 = arith.constant 0 : i32
    %c0_i32_16 = arith.constant 0 : i32
    %33 = tpu.memref_slice %arg3[%1, %c0_i32_15, %c0_i32_16] : memref<8x16x16xf32, #tpu.memory_space<any>> -> memref<8x16x16xf32, #tpu.memory_space<any>>
    tpu.wait_dma2 semaphore(%arg5 : memref<!tpu.dma_semaphore, #tpu.memory_space<semaphore_mem>>) src(%arg4 : memref<8x16x16xf32, #tpu.memory_space<vmem>>) dst(%33 : memref<8x16x16xf32, #tpu.memory_space<any>>)
    return
  }
}

</mosaic_0001>

<bundles_post_ra>
// kernel: tpu_custom_call.1
= control target key start
LH: loop header
LB: loop body
LE: loop exit
PB: predicated region body
PF: predicated region fallthrough
CT: control target
= control target key end

     0   :  { %s319_s0 = inlined_call_operand.vmem [shape: s32[2], index: 0, kind: input, shape index: {}]   ;;  %s320_s1 = inlined_call_operand.hbm [shape: f32[8,16,16], index: 1, kind: input, shape index: {}, may-alias: {1,2}]   ;;  %s321_s2 = inlined_call_operand.hbm [shape: f32[8,16,16], index: 2, kind: output, shape index: {}, may-alias: {1,2}]  }
   0x1   :  { %s7_s11 = sshll.u32 %s319_s0, 4  ;;  %s8_s11 = int_to_ptr.vmem [resolvable:$true] %s7_s11 }
   0x2   :  { %s149_s12 = scalar_lea.vmem %s8_s11, 16  ;;  %p154_p1 = scmp.lt.s32.totalorder %s8_s11, %s8_s11 }
   0x3   :  { %p150_p0 = scmp.ne.s32.totalorder %s8_s11, %s149_s12  ;;  %p155_p2 = scmp.lt.s32.totalorder %s149_s12, %s149_s12 }
   0x5   :  { %p156_p3 = por %p155_p2, %p154_p1 }
   0x7   :  { %p157_p4 = pnand %p156_p3, %p150_p0 }
   0x9   :  { %160 = shalt.err (!%p157_p4)  }
   0xa   :  { %s207_s13 = smov [#allocation5]  }
   0xb   :  { %10 = dma.vmem_to_smem %s8_s11, 16, %s207_s13, [#allocation4] }
   0xc   :  { %201 = dma.done.wait [#allocation4], 16 }
   0xd   :  { %202 = vsyncadd [#allocation4], 4294967280 }
   0xe   :  { %12 = sfence }
   0xf   :  { %s227_s14 = sld [smem:[#allocation5]]  ;;  %s208_s16 = smov [#allocation2]  }
  0x10   :  { %s145_s15 = sld [smem:[#allocation5 + $0x1]]  ;;  %s28_s17 = sshll.u32 %s208_s16, 4  ;;  %s229_s17 = int_to_ptr.vmem [resolvable:$true] %s28_s17 }
  0x11   :  { %s169_s0 = scalar_lea.vmem %s229_s17, 2048  ;;  %p174_p6 = scmp.lt.s32.totalorder %s229_s17, %s229_s17 }
  0x12   :  { %p170_p5 = scmp.ne.s32.totalorder %s229_s17, %s169_s0  ;;  %p175_p7 = scmp.lt.s32.totalorder %s169_s0, %s169_s0 }
  0x14   :  { %p176_p8 = por %p175_p7, %p174_p6 }
  0x16   :  { %p235_p9 = pnand %p176_p8, %p170_p5 }
  0x18   :  { %180 = shalt.err (!%p235_p9)  }
  0x19   :  { %31 = dma.hbm_to_vmem [thread:$0]  %s320_s1, 2048, %s229_s17, [#allocation3] }
  0x1a   :  { %203 = dma.done.wait [#allocation3], 2048 }
  0x1b   :  { %204 = vsyncadd [#allocation3], 4294965248  ;;  %v52_v0 = vlaneseq  ;;  %s60_s21 = sadd.s32 8, %s227_s14  ;;  %s76_s22 = sadd.s32 8, %s145_s15  ;;  %v57_v1 = vstv %s227_s14  ;;  %v66_v3 = vstv %s145_s15  ;;  %vm103_vm6 = vcmask 130048   ;;  %v36_v9 = vld [vmem:[#allocation2] sm:$0xff] }
  0x1c   :  { %v61_v2 = vstv %s60_s21  ;;  %v77_v4 = vstv %s76_s22  ;;  %v37_v11 = vld [vmem:[#allocation2 + $0x8] sm:$0xff]  ;;  %v38_v13 = vld [vmem:[#allocation2 + $0x10] sm:$0xff]  ;;  %v39_v14 = vld [vmem:[#allocation2 + $0x18] sm:$0xff] }
  0x1d   :  { %v53_v5 = vshrl.u32 %v52_v0, 7  ;;  %v56_v6 = vand.u32 127, %v52_v0  ;;  %v40_v16 = vld [vmem:[#allocation2 + $0x20] sm:$0xff]  ;;  %v41_v17 = vld [vmem:[#allocation2 + $0x28] sm:$0xff]  ;;  %v42_v20 = vld [vmem:[#allocation2 + $0x30] sm:$0xff] }
  0x1e   :  { %v43_v21 = vld [vmem:[#allocation2 + $0x38] sm:$0xff]  ;;  %v44_v26 = vld [vmem:[#allocation2 + $0x40] sm:$0xff]  ;;  %v45_v27 = vld [vmem:[#allocation2 + $0x48] sm:$0xff] }
  0x1f   :  { %vm58_vm0 = vcmp.ge.s32.totalorder %v53_v5, %v57_v1  ;;  %vm62_vm1 = vcmp.lt.s32.totalorder %v53_v5, %v61_v2  ;;  %vm247_vm2 = vcmp.ge.s32.totalorder %v56_v6, %v66_v3  ;;  %vm78_vm3 = vcmp.lt.s32.totalorder %v56_v6, %v77_v4  ;;  %v46_v31 = vld [vmem:[#allocation2 + $0x50] sm:$0xff]  ;;  %v47_v32 = vld [vmem:[#allocation2 + $0x58] sm:$0xff]  ;;  %v48_v33 = vld [vmem:[#allocation2 + $0x60] sm:$0xff] }
  0x20   :  { %vm64_vm4 = vmand %vm58_vm0, %vm62_vm1  ;;  %v54_v8 = vadd.s32 8, %v53_v5  ;;  %v49_v37 = vld [vmem:[#allocation2 + $0x68] sm:$0xff]  ;;  %v50_v38 = vld [vmem:[#allocation2 + $0x70] sm:$0xff] }
  0x21   :  { %vm74_vm5 = vmand %vm64_vm4, %vm247_vm2  ;;  %v51_v39 = vld [vmem:[#allocation2 + $0x78] sm:$0xff] }
  0x22   :  { %vm254_vm7 = vmand %vm74_vm5, %vm78_vm3  ;;  %vm59_vm8 = vcmp.ge.s32.totalorder %v54_v8, %v57_v1  ;;  %vm63_vm9 = vcmp.lt.s32.totalorder %v54_v8, %v61_v2 }
  0x23   :  { %v87_v12 = vsel %vm254_vm7, 1.0, %v36_v9  ;;  %vm65_vm10 = vmand %vm59_vm8, %vm63_vm9  ;;  %v89_v15 = vsel %vm254_vm7, 1.0, %v38_v13  ;;  %v91_v19 = vsel %vm254_vm7, 1.0, %v40_v16  ;;  %v93_v25 = vsel %vm254_vm7, 1.0, %v42_v20 }
  0x24   :  { %104 = vst.msk [vmem:[#allocation2] sm:$0xff] %vm103_vm6, %v87_v12  ;;  %vm75_vm11 = vmand %vm65_vm10, %vm247_vm2  ;;  %v95_v29 = vsel %vm254_vm7, 1.0, %v44_v26  ;;  %v97_v34 = vsel %vm254_vm7, 1.0, %v46_v31  ;;  %v99_v36 = vsel %vm254_vm7, 1.0, %v48_v33  ;;  %v101_v41 = vsel %vm254_vm7, 1.0, %v50_v38 }
  0x25   :  { %vm266_vm12 = vmand %vm75_vm11, %vm78_vm3  ;;  %106 = vst.msk [vmem:[#allocation2 + $0x10] sm:$0xff] %vm103_vm6, %v89_v15 }
  0x26   :  { %v88_v22 = vsel %vm266_vm12, 1.0, %v37_v11  ;;  %v90_v23 = vsel %vm266_vm12, 1.0, %v39_v14  ;;  %108 = vst.msk [vmem:[#allocation2 + $0x20] sm:$0xff] %vm103_vm6, %v91_v19  ;;  %v92_v24 = vsel %vm266_vm12, 1.0, %v41_v17  ;;  %110 = vst.msk [vmem:[#allocation2 + $0x30] sm:$0xff] %vm103_vm6, %v93_v25  ;;  %v94_v28 = vsel %vm266_vm12, 1.0, %v43_v21 }
  0x27   :  { %105 = vst.msk [vmem:[#allocation2 + $0x8] sm:$0xff] %vm103_vm6, %v88_v22  ;;  %107 = vst.msk [vmem:[#allocation2 + $0x18] sm:$0xff] %vm103_vm6, %v90_v23  ;;  %v96_v30 = vsel %vm266_vm12, 1.0, %v45_v27  ;;  %v98_v35 = vsel %vm266_vm12, 1.0, %v47_v32  ;;  %v100_v40 = vsel %vm266_vm12, 1.0, %v49_v37  ;;  %v102_v42 = vsel %vm266_vm12, 1.0, %v51_v39 }
  0x28   :  { %109 = vst.msk [vmem:[#allocation2 + $0x28] sm:$0xff] %vm103_vm6, %v92_v24  ;;  %111 = vst.msk [vmem:[#allocation2 + $0x38] sm:$0xff] %vm103_vm6, %v94_v28 }
  0x29   :  { %112 = vst.msk [vmem:[#allocation2 + $0x40] sm:$0xff] %vm103_vm6, %v95_v29  ;;  %113 = vst.msk [vmem:[#allocation2 + $0x48] sm:$0xff] %vm103_vm6, %v96_v30 }
  0x2a   :  { %114 = vst.msk [vmem:[#allocation2 + $0x50] sm:$0xff] %vm103_vm6, %v97_v34  ;;  %115 = vst.msk [vmem:[#allocation2 + $0x58] sm:$0xff] %vm103_vm6, %v98_v35 }
  0x2b   :  { %116 = vst.msk [vmem:[#allocation2 + $0x60] sm:$0xff] %vm103_vm6, %v99_v36  ;;  %117 = vst.msk [vmem:[#allocation2 + $0x68] sm:$0xff] %vm103_vm6, %v100_v40 }
  0x2c   :  { %118 = vst.msk [vmem:[#allocation2 + $0x70] sm:$0xff] %vm103_vm6, %v101_v41  ;;  %119 = vst.msk [vmem:[#allocation2 + $0x78] sm:$0xff] %vm103_vm6, %v102_v42 }
  0x2d   :  { %192 = shalt.err (!%p235_p9)  }
  0x2e   :  { %132 = dma.vmem_to_hbm [thread:$0]  %s229_s17, 2048, %s321_s2, [#allocation3] }
  0x2f   :  { %205 = dma.done.wait [#allocation3], 2048 }
  0x30   :  { %206 = vsyncadd [#allocation3], 4294965248 }
  0x31   :  { %135 = vsyncmov [#allocation3] }
  0x34   :  { %s136_s24 = vpop.sfrf %135 }
  0x35   :  { %p146_p10 = scmp.ne.s32.totalorder %s136_s24, 0 }
  0x37   :  { %140 = shalt.err (%p146_p10)  }

</bundles_post_ra>
